<compile_context>
chip_gen: v7x
topology: tpu7x:2x2x1
jax: 0.10.0
libtpu: 0.0.40
codegen_flags: <defaults>
</compile_context>

<pallas_src>
import functools

import jax
import jax.numpy as jnp
from jax.experimental import pallas as pl
from jax.experimental.pallas import tpu as pltpu


def _round_up(v, m):
    return (v + m - 1) // m * m


def _pick_tm(m, tm_max=512):
    """Pick the M tile size.

    Preference order: (1) >= 2 grid steps when M allows (v7x megacore),
    (2) padding waste within a small tolerance, (3) the largest tile
    (per-step-overhead amortization, mem-bound on v6e/v7x), (4) least waste.
    All candidates are multiples of 16 (bf16 sublane packing).
    """
    tm_cap = max(16, min(_round_up(tm_max, 16), _round_up(m, 16)))
    waste_tol = max(16, m // 64)
    best_key, best_tm = None, 16
    for cand in range(16, tm_cap + 1, 16):
        m_pad = _round_up(m, cand)
        waste = m_pad - m
        steps = m_pad // cand
        key = (steps >= 2, waste <= waste_tol, cand, -waste)
        if best_key is None or key > best_key:
            best_key, best_tm = key, cand
    return best_tm


def _patch_embed_kernel(x_ref, w_ref, b_ref, o_ref):
    # x_ref: (TM, K_pad) bf16 patches, w_ref: (K_pad, E_pad) bf16, b_ref: (1, E_pad) f32.
    acc = jnp.dot(x_ref[...], w_ref[...], preferred_element_type=jnp.float32)
    o_ref[...] = (acc + b_ref[...]).astype(o_ref.dtype)


def prepare_patch_embed_params(weight, bias):
    """One-time parameter prep, hoisted out of the per-forward hot path.

    weight: (E, C, P, P) PyTorch Conv2d layout;  bias: (E,)
    Returns w_mat (K_pad, E_pad) bf16 and b_mat (1, E_pad) f32 with
    K_pad = round_up(C*P*P, 128), E_pad = round_up(E, 128).
    """
    E, C, P, _ = weight.shape
    K = C * P * P
    K_pad = _round_up(K, 128)
    E_pad = _round_up(E, 128)
    # (E, C, P, P) -> (K, E) so out[m, e] = sum_k patch[m, k] * w_mat[k, e].
    w_mat = weight.reshape(E, K).T.astype(jnp.bfloat16)
    w_mat = jnp.pad(w_mat, ((0, K_pad - K), (0, E_pad - E)))
    b_mat = jnp.pad(bias.astype(jnp.float32), (0, E_pad - E)).reshape(1, E_pad)
    return w_mat, b_mat


@functools.partial(
    jax.jit, static_argnames=("patch_size", "embed_dim", "tm_max", "out_dtype")
)
def patch_embed_forward(x, w_mat, b_mat, *, patch_size, embed_dim, tm_max=512,
                        out_dtype=None):
    """Equivalent to nn.Conv2d(C, E, kernel_size=P, stride=P) + flatten(2).transpose(1, 2).

    x:     (B, C, H, W)
    w_mat: (K_pad, E_pad) bf16  (from prepare_patch_embed_params)
    b_mat: (1, E_pad) f32
    returns (B, n_patches, E), n_patches = (H // P) * (W // P)
    """
    B, C, H, W = x.shape
    P = patch_size
    E = embed_dim
    assert H % P == 0 and W % P == 0, "image size must be divisible by patch size"
    Hp, Wp = H // P, W // P
    n_patches = Hp * Wp
    K = C * P * P
    M = B * n_patches
    K_pad, E_pad = w_mat.shape
    assert K_pad == _round_up(K, 128) and E_pad >= E, "params not prepared for this x"
    out_dtype = x.dtype if out_dtype is None else out_dtype

    # --- im2col: stride==kernel conv -> (M, K) patch matrix ---
    # Left to XLA; allow_input_fusion below permits fusing this transpose/cast/pad
    # chain into the pallas_call operand instead of a separate HBM materialization.
    patches = x.reshape(B, C, Hp, P, Wp, P).transpose(0, 2, 4, 1, 3, 5)
    patches = patches.reshape(M, K).astype(jnp.bfloat16)

    # --- tiling / padding (minimal-waste M tiles, lane-dense K/E) ---
    TM = _pick_tm(M, tm_max)
    M_pad = _round_up(M, TM)
    if M_pad != M or K_pad != K:
        patches = jnp.pad(patches, ((0, M_pad - M), (0, K_pad - K)))

    grid = (M_pad // TM,)
    out_itemsize = jnp.dtype(out_dtype).itemsize

    # Scoped-VMEM budget from the actual (double-buffered) tile sizes.
    tile_bytes = (
        2 * TM * K_pad * 2          # bf16 patch tiles (double-buffered)
        + 2 * K_pad * E_pad * 2     # bf16 weights (revisited; counted x2 to be safe)
        + 2 * E_pad * 4             # f32 bias
        + 2 * TM * E_pad * out_itemsize  # output tiles (double-buffered)
    )
    vmem_limit_bytes = int(min(max(2 * tile_bytes + (4 << 20), 16 << 20), 64 << 20))

    bytes_accessed = (
        M_pad * K_pad * 2           # bf16 patch stream (dominant HBM traffic)
        + K_pad * E_pad * 2         # bf16 weights
        + E_pad * 4                 # f32 bias
        + M_pad * E_pad * out_itemsize  # output
    )

    out = pl.pallas_call(
        _patch_embed_kernel,
        out_shape=jax.ShapeDtypeStruct((M_pad, E_pad), out_dtype),
        grid_spec=pltpu.PrefetchScalarGridSpec(
            num_scalar_prefetch=0,
            grid=grid,
            in_specs=[
                pl.BlockSpec((TM, K_pad), lambda i: (i, 0)),      # patch tile (streamed)
                pl.BlockSpec((K_pad, E_pad), lambda i: (0, 0)),   # weights (resident)
                pl.BlockSpec((1, E_pad), lambda i: (0, 0)),       # bias (resident)
            ],
            out_specs=pl.BlockSpec((TM, E_pad), lambda i: (i, 0)),
        ),
        compiler_params=pltpu.CompilerParams(
            # Independent M tiles -> megacore sharding on v7x, harmless elsewhere.
            dimension_semantics=("parallel",),
            # Let XLA fuse the im2col/cast/pad producer into operand 0.
            allow_input_fusion=[True, False, False],
            vmem_limit_bytes=vmem_limit_bytes,
        ),
        cost_estimate=pl.CostEstimate(
            flops=2 * M_pad * K_pad * E_pad,
            transcendentals=0,
            bytes_accessed=bytes_accessed,
        ),
    )(patches, w_mat, b_mat)

    if M_pad != M or E_pad != E:
        out = out[:M, :E]
    return out.reshape(B, n_patches, E)


if __name__ == "__main__":
    # Small, module-consistent shapes: img_size=16, patch_size=4, in_chans=4, embed_dim=32.
    # (Exercises K padding 64->128, E padding 32->128, and a 2-step parallel grid.)
    B, C, H, W = 2, 4, 16, 16
    P = 4
    E = 32

    key = jax.random.PRNGKey(0)
    kx, kw, kb = jax.random.split(key, 3)

    x = jax.random.normal(kx, (B, C, H, W), dtype=jnp.float32)
    # Deterministic synthetic parameters (PyTorch Conv2d weight/bias shapes).
    weight = jax.random.normal(kw, (E, C, P, P), dtype=jnp.float32) * 0.02
    bias = jax.random.normal(kb, (E,), dtype=jnp.float32) * 0.01

    # One-time prep (hoisted out of the hot path).
    w_mat, b_mat = prepare_patch_embed_params(weight, bias)

    out = patch_embed_forward(x, w_mat, b_mat, patch_size=P, embed_dim=E)
    out = jax.block_until_ready(out)

    # Pure-JAX f32 reference (same math as PyTorch Conv2d stride=kernel + flatten/transpose).
    Hp, Wp = H // P, W // P
    ref_patches = x.reshape(B, C, Hp, P, Wp, P).transpose(0, 2, 4, 1, 3, 5)
    ref_patches = ref_patches.reshape(B, Hp * Wp, C * P * P)
    ref = jnp.einsum("bnk,ke->bne", ref_patches, weight.reshape(E, -1).T) + bias

    assert out.shape == (B, Hp * Wp, E), out.shape
    # bf16 MXU inputs with f32 accumulation: ~1e-2-level agreement vs the f32 ref.
    assert jnp.allclose(out, ref, atol=2e-2, rtol=2e-2), "mismatch vs reference"

    print("KERNEL_OK")
</pallas_src>

<mosaic_0001>
module attributes {stable_mosaic.version = 11 : i64} {
  func.func @_patch_embed_kernel(%arg0: i32, %arg1: memref<16x128xbf16, #tpu.memory_space<vmem>>, %arg2: memref<128x128xbf16, #tpu.memory_space<vmem>>, %arg3: memref<1x128xf32, #tpu.memory_space<vmem>>, %arg4: memref<16x128xf32, #tpu.memory_space<vmem>>) attributes {dimension_semantics = [#tpu.dimension_semantics<parallel>], iteration_bounds = array<i64: 2>, scalar_prefetch = 0 : i64, scratch_operands = 0 : i64, tpu.core_type = #tpu.core_type<tc>, window_params = [{transform_indices = @transform_0, window_bounds = array<i64: 16, 128>}, {pipeline_mode = #tpu.pipeline_mode<synchronous>, transform_indices = @transform_1, window_bounds = array<i64: 128, 128>}, {pipeline_mode = #tpu.pipeline_mode<synchronous>, transform_indices = @transform_2, window_bounds = array<i64: 1, 128>}, {transform_indices = @transform_3, window_bounds = array<i64: 16, 128>}]} {
    %c0 = arith.constant 0 : index
    %c0_0 = arith.constant 0 : index
    %0 = vector.load %arg1[%c0, %c0_0] : memref<16x128xbf16, #tpu.memory_space<vmem>>, vector<16x128xbf16>
    %c0_1 = arith.constant 0 : index
    %c0_2 = arith.constant 0 : index
    %1 = vector.load %arg2[%c0_1, %c0_2] : memref<128x128xbf16, #tpu.memory_space<vmem>>, vector<128x128xbf16>
    %cst = arith.constant dense<0.000000e+00> : vector<16x128xf32>
    %2 = tpu.matmul %0, %1, %cst {dimension_numbers = #tpu.dot_dimension_numbers<[1], [0], [0], [1], [0, 0, 1, 1], [], []>} : vector<16x128xbf16>, vector<128x128xbf16>, vector<16x128xf32> -> vector<16x128xf32>
    %c0_3 = arith.constant 0 : index
    %c0_4 = arith.constant 0 : index
    %3 = vector.load %arg3[%c0_3, %c0_4] : memref<1x128xf32, #tpu.memory_space<vmem>>, vector<1x128xf32>
    %4 = vector.broadcast %3 : vector<1x128xf32> to vector<16x128xf32>
    %5 = arith.addf %2, %4 : vector<16x128xf32>
    %c0_5 = arith.constant 0 : index
    %c0_6 = arith.constant 0 : index
    %6 = vector.load %arg4[%c0_5, %c0_6] : memref<16x128xf32, #tpu.memory_space<vmem>>, vector<16x128xf32>
    tpu.vector_store %arg4[%c0_5, %c0_6], %5 {strides = array<i32>} : memref<16x128xf32, #tpu.memory_space<vmem>>, vector<16x128xf32>,
    return
  }
  func.func @transform_0(%arg0: i32) -> (i32, i32) {
    %c0_i32 = arith.constant 0 : i32
    %c0_i32_0 = arith.constant 0 : i32
    return %arg0, %c0_i32 : i32, i32
  }
  func.func @transform_1(%arg0: i32) -> (i32, i32) {
    %c0_i32 = arith.constant 0 : i32
    %c0_i32_0 = arith.constant 0 : i32
    %c0_i32_1 = arith.constant 0 : i32
    return %c0_i32, %c0_i32_0 : i32, i32
  }
  func.func @transform_2(%arg0: i32) -> (i32, i32) {
    %c0_i32 = arith.constant 0 : i32
    %c0_i32_0 = arith.constant 0 : i32
    %c0_i32_1 = arith.constant 0 : i32
    return %c0_i32, %c0_i32_0 : i32, i32
  }
  func.func @transform_3(%arg0: i32) -> (i32, i32) {
    %c0_i32 = arith.constant 0 : i32
    %c0_i32_0 = arith.constant 0 : i32
    return %arg0, %c0_i32 : i32, i32
  }
}

</mosaic_0001>

<bundles_post_ra>
// kernel: patch_embed_forward.2
= control target key start
LH: loop header
LB: loop body
LE: loop exit
PB: predicated region body
PF: predicated region fallthrough
CT: control target
= control target key end

     0   :  { %s754_s0 = inlined_call_operand.vmem [shape: bf16[128,128], index: 0, kind: input, shape index: {}]   ;;  %s755_s1 = inlined_call_operand.vmem [shape: f32[1,128], index: 1, kind: input, shape index: {}]   ;;  %s756_s2 = inlined_call_operand.vmem [shape: bf16[32,64], index: 2, kind: input, shape index: {}]   ;;  %s757_s3 = inlined_call_operand.<no memory space> [shape: bf16[], index: 3, kind: input, shape index: {}]   ;;  %s758_s4 = inlined_call_operand.hbm [shape: f32[32,128], index: 4, kind: output, shape index: {}]  }
   0x1   :  { %v9_v0 = vstv %s757_s3 }
   0x2   :  { %v621_v1 = vunpack.i.l.bf16 %v9_v0 }
   0x3   :  { %14 = vsyncpa [#allocation8], 0 }
   0x4   :  { %16 = vsyncpa [#allocation8 + $0x1], 0  ;;  %s623_s17 = smov 0   ;;  %s625_s18 = smov 0  }
   0x5   :  { %s627_s19 = smov 0   ;;  %s629_s20 = smov 0  }
   0x6 LB: > { %s644_s3 = sadd.s32 4294967295, %s586_s20   ;;  %s419_s21 = sadd.s32 4294967294, %s586_s20   ;;  %s586_s20 = sphi %s629_s20, %s764_s20   ;;  %s582_s19 = sphi %s627_s19, %s763_s19   ;;  %s578_s18 = sphi %s625_s18, %s762_s18   ;;  %s574_s17 = sphi %s623_s17, %s761_s17  }
   0x7   : > { %s648_s22 = sadd.s32 1, %s586_s20   ;;  %s97_s23 = sadd.s32 1, %s582_s19 }
   0x8   : > { %s94_s24 = ssub.s32 %s586_s20, %s648_s22  ;;  %p107_p0 = scmp.ne.s32.totalorder %s582_s19, %s578_s18 }
   0x9   : > { %p95_p1 = scmp.eq.s32.totalorder %s94_s24, 0  ;;  %p108_p2 = scmp.eq.s32.totalorder %s644_s3, 1 }
   0xa   : > { %p113_p3 = scmp.ne.s32.totalorder %s578_s18, %s574_s17  ;;  %p114_p4 = scmp.eq.s32.totalorder %s419_s21, 1 }
   0xb   : > { %s659_s25 = scalar_select %p95_p1, %s582_s19, %s97_s23  }
   0xc   : > { %p661_p5 = por %p108_p2, %p107_p0  ;;  %p665_p6 = por %p114_p4, %p113_p3 }
   0xd   : > { %p422_p7 = scmp.ge.s32.totalorder %s586_s20, 1  ;;  %p147_p8 = scmp.lt.s32.totalorder %s586_s20, 3 }
   0xf   : > { %p148_p9 = pnand %p422_p7, %p147_p8 }
  0x11   : > { %151 = sbr.rel (%p148_p9) target bundleno = 288 (0x120), region = 32 }
  0x18   : > { %v515_v2 = vld [vmem:[%s754_s0] sm:$0xff]   ;;  %v588_v3 = vmov 0.0   ;;  %v190_v4 = vlaneseq  ;;  %v516_v5 = vld [vmem:[%s754_s0 + $0x8] sm:$0xff]   ;;  %vm589_vm0 = vmmov 0   ;;  %s424_s6 = sshll.u32 %s644_s3, 1  ;;  %v517_v7 = vld [vmem:[%s754_s0 + $0x10] sm:$0xff]  }
  0x19   : > { %452 = vmatprep.subr.bf16.mxu0 %v588_v3  ;;  %468 = vmatprep.mubr.msk.bf16.mxu0 %vm589_vm0, %v588_v3  ;;  %p172_p10 = scmp.lt.s32.totalorder %s424_s6, 3  ;;  %v518_v9 = vld [vmem:[%s754_s0 + $0x18] sm:$0xff]   ;;  %v519_v16 = vld [vmem:[%s754_s0 + $0x20] sm:$0xff]   ;;  %v520_v17 = vld [vmem:[%s754_s0 + $0x28] sm:$0xff]   ;;  %s168_s5 = sand.u32 1, %s578_s18  }
  0x1a   : > { %453 = vmatpush3.bf16.msra.mxu0 %v515_v2  ;;  %v191_v6 = vand.u32 127, %v190_v4  ;;  %v521_v18 = vld [vmem:[%s754_s0 + $0x30] sm:$0xff]   ;;  %v522_v19 = vld [vmem:[%s754_s0 + $0x38] sm:$0xff]   ;;  %v427_v21 = vld [vmem:[%s755_s1] ss:$0 sm:$0xff]  ;;  %s442_s11 = sshll.u32 %s644_s3, 8 }
  0x1b   : > { %454 = vmatprep.subr.bf16.mxu0 %v588_v3  ;;  %s766_s6 = smov (!%p172_p10, %s424_s6), 3  ;;  %s711_s14 = scalar_lea.hbm %s758_s4, %s442_s11 }
  0x1c   : > { %s425_s9 = sshll.u32 %s766_s6, 2  ;;  %vm193_vm1 = vcmp.lt.s32.totalorder %v191_v6, 64  ;;  %s423_s6 = sshll.u32 %s168_s5, 4 }
  0x1d   : > { %s175_s12 = scalar_lea.vmem %s756_s2, %s425_s9  ;;  %s170_s9 = scalar_lea.vmem [#allocation7], %s423_s6 }
  0x1e   : > { %455 = vmatpush3.bf16.msra.mxu0 %v516_v5  ;;  %v187_v8 = vld [vmem:[%s175_s12] sm:$0xff]   ;;  %s357_s10 = sshll.u32 %s170_s9, 4  ;;  %s713_s15 = scalar_lea.sflag [#allocation8], %s168_s5  ;;  %s706_s10 = int_to_ptr.vmem [resolvable:$true] %s357_s10 }
  0x1f   : > { %456 = vmatprep.subr.bf16.mxu0 %v588_v3  ;;  %v188_v10 = vunpack.c.l.bf16 %v187_v8  ;;  %v209_v11 = vunpack.c.h.bf16 %v187_v8  ;;  %s524_s3 = scalar_lea.vmem %s706_s10, 256  ;;  %s590_s16 = smov [#allocation7]  }
  0x20   : > { %p525_p11 = scmp.ne.s32.totalorder %s706_s10, %s524_s3  ;;  %s528_s21 = sshll.u32 %s590_s16, 4  ;;  %s529_s21 = int_to_ptr.vmem [resolvable:$false] %s528_s21 }
  0x21   : > { %v194_v12 = vsel %vm193_vm1, %v188_v10, %v621_v1  ;;  %v215_v13 = vsel %vm193_vm1, %v209_v11, %v621_v1  ;;  %s530_s23 = scalar_lea.vmem %s529_s21, 512  ;;  %p531_p0 = scmp.lt.s32.totalorder %s706_s10, %s529_s21 }
  0x22   : > { %457 = vmatpush3.bf16.msra.mxu0 %v517_v7  ;;  %v195_v14 = vpack.c.bf16 %v588_v3, %v194_v12  ;;  %v217_v15 = vpack.c.bf16 %v588_v3, %v215_v13  ;;  %p526_p12 = pnand %p525_p11, %p661_p5  ;;  %p532_p1 = scmp.lt.s32.totalorder %s530_s23, %s524_s3 }
  0x23   : > { %458 = vmatprep.subr.bf16.mxu0 %v588_v3 }
  0x24   : > { %197 = vst [vmem:[#allocation9] sm:$0xf] %v195_v14  ;;  %219 = vst [vmem:[#allocation9 + $0x4] sm:$0xf] %v217_v15  ;;  %p527_p13 = pneg %p526_p12  ;;  %p533_p2 = por %p532_p1, %p531_p0 }
  0x26   : > { %459 = vmatpush3.bf16.msra.mxu0 %v518_v9  ;;  %p534_p3 = pnand %p533_p2, %p527_p13 }
  0x27   : > { %460 = vmatprep.subr.bf16.mxu0 %v588_v3 }
  0x2a   : > { %461 = vmatpush3.bf16.msra.mxu0 %v519_v16 }
  0x2b   : > { %462 = vmatprep.subr.bf16.mxu0 %v588_v3  ;;  %v523_v20 = vld [vmem:[#allocation9] sm:$0xff]  }
  0x2e   : > { %463 = vmatpush3.bf16.msra.mxu0 %v520_v17 }
  0x2f   : > { %464 = vmatprep.subr.bf16.mxu0 %v588_v3 }
  0x32   : > { %465 = vmatpush3.bf16.msra.mxu0 %v521_v18 }
  0x33   : > { %466 = vmatprep.subr.bf16.mxu0 %v588_v3 }
  0x36   : > { %467 = vmatpush3.bf16.msra.mxu0 %v522_v19 }
  0x39   : > { %469 = vmatmul.mubr.bf16.vlgmr.msra.gmra.mrb[0].mxu0 %v523_v20 }
 0x10c   : > { %v334_v22 = vpop.f32.mrb[0].mxu0 }
 0x10d   : > { %v335_v23 = vadd.f32 %v427_v21, %v334_v22  ;;  %v470_v24 = vpop.f32.mrb[1].mxu0 }
 0x10e   : > { %v337_v25 = vpop.f32.mrb[2].mxu0 }
 0x10f   : > { %341 = vst [vmem:[%s170_s9] sm:$0xff] %v335_v23  ;;  %v338_v26 = vadd.f32 %v427_v21, %v337_v25  ;;  %v471_v27 = vpop.f32.mrb[3].mxu0 }
 0x111   : > { %342 = vst [vmem:[%s170_s9 + $0x8] sm:$0xff] %v338_v26 }
 0x112   : > { %537 = shalt.err (!%p534_p3)
}
 0x113   : > { %s538_s24 = scalar_lea.hbm %s711_s14, 256  ;;  %s542_s30 = scalar_lea.hbm %s758_s4, 512 }
 0x114   : > { %p539_p4 = scmp.ne.s32.totalorder %s711_s14, %s538_s24  ;;  %p543_p9 = scmp.lt.u32.totalorder %s711_s14, %s758_s4 }
 0x115   : > { %p544_p10 = scmp.lt.u32.totalorder %s542_s30, %s538_s24  ;;  %p546_p12 = scmp.lt.u32.totalorder %s538_s24, %s711_s14 }
 0x116   : > { %p540_p7 = pnand %p539_p4, %p661_p5 }
 0x117   : > { %p545_p11 = por %p544_p10, %p543_p9 }
 0x118   : > { %p541_p8 = pneg %p540_p7 }
 0x119   : > { %p547_p13 = por %p546_p12, %p545_p11 }
 0x11b   : > { %p548_p0 = pnand %p547_p13, %p541_p8 }
 0x11d   : > { %551 = shalt.err (!%p548_p0)
}
 0x11e   : > { %s591_s7 = smov 128   ;;  %s592_s8 = smov 8  }
 0x11f   : > { %472 = dma.vmem_to_hbm [thread:$0]  (%p661_p5), %s706_s10, 256, %s711_s14, %s713_s15, %s591_s7, %s591_s7, %s592_s8  }
 0x120 PF: > { %p478_p1 = scmp.ge.s32.totalorder %s586_s20, 2  ;;  %s372_s9 = sand.u32 1, %s574_s17  }
 0x121   : > { %s373_s11 = scalar_lea.sflag [#allocation8], %s372_s9 }
 0x122   : > { %p475_p2 = pnand %p478_p1, %p665_p6 }
 0x124   : > { %569 = dma.done.wait (!%p475_p2), %s373_s11, 256  }
 0x125   : > { %571 = vsyncadd (!%p475_p2), %s373_s11, 4294967040  ;;  %p19_p3 = scmp.ge.s32.totalorder %s648_s22, 4   ;;  %s761_s17 = smov %s578_s18 }
 0x126   : > { %s762_s18 = smov %s582_s19  ;;  %s763_s19 = smov %s659_s25 }
 0x127   : > { %s764_s20 = smov %s648_s22  ;;  %21 = sbr.rel (!%p19_p3) target bundleno = 6 (0x6), region = 69 }
 0x12e   :  { %378 = vsyncpa [#allocation8], 1 }
 0x12f   :  { %380 = vsyncpa [#allocation8 + $0x1], 1 }

</bundles_post_ra>
